<compile_context>
chip_gen: v7x
topology: tpu7x:2x2x1
jax: 0.10.0
libtpu: 0.0.40
codegen_flags: <defaults>
</compile_context>

<pallas_src>
import math
import jax
import jax.numpy as jnp
from jax.experimental import pallas as pl
from jax.experimental.pallas import tpu as pltpu

EPS = 1e-5


def _make_fused_nalu_kernel(n_layers, out_dims):
    """Kernel fusing `n_layers` NALU cells, lane-dense (features, batch) layout.

    refs layout: (x_ref, WG_0, ..., WG_{L-1}, o_ref)
      x_ref : (in_0, tb)        activations, batch on lanes
      WG_l  : (2*out_l, in_l)   row-stacked [W_l ; G_l], bf16
      o_ref : (out_{L-1}, tb)
    """

    def kernel(*refs):
        x_ref = refs[0]
        o_ref = refs[-1]
        wg_refs = refs[1:-1]

        h = x_ref[...].astype(jnp.float32)                      # (in_0, tb)

        for l in range(n_layers):                               # static -> fully unrolled
            wg = wg_refs[l][...]                                # (2*out_l, in_l), bf16
            out_l = out_dims[l]

            log_in = jnp.log(jnp.abs(h) + EPS)                  # f32 elementwise (EUP)

            # One MXU matmul yields both the additive path and the gate pre-activation.
            ag = jnp.dot(wg, h.astype(wg.dtype),
                         preferred_element_type=jnp.float32)    # (2*out_l, tb)
            a = ag[:out_l]
            g = jax.nn.sigmoid(ag[out_l:])

            # Log-space (multiplicative) path reuses the W half of the stacked weights.
            m = jnp.exp(jnp.dot(wg[:out_l], log_in.astype(wg.dtype),
                                preferred_element_type=jnp.float32))   # (out_l, tb)

            h = g * a + (1.0 - g) * m                           # f32 blend (VPU)

        o_ref[...] = h.astype(o_ref.dtype)

    return kernel


def nalu_layer_forward(params, x, *, tb=None, mm_dtype=jnp.bfloat16):
    """Full NaluLayer forward in one pallas_call.

    params: list of dicts with 'W_', 'M_', 'G' each of shape (out_l, in_l) (PyTorch layout)
    x:      (B, input_shape)
    tb:     batch tile (lanes). Default: full batch (single grid step) unless B is huge.
    """
    B, in_dim = x.shape
    n_layers = len(params)
    out_dims = tuple(int(p["W_"].shape[0]) for p in params)
    out_dim = out_dims[-1]

    # ---- batch tile: default to a single grid step; tile only for very large batches.
    if tb is None:
        tb = B
        max_rows = 8192                        # ~1 MiB per input tile at 32 features
        if B > max_rows and B % 128 == 0:
            cands = [t for t in range(128, max_rows + 1, 128) if B % t == 0]
            if cands:
                tb = max(cands)
    tb = min(tb, B)
    assert B % tb == 0, "batch must be divisible by the batch tile"
    assert tb == B or tb % 128 == 0, "batch tile must be lane-aligned (multiple of 128)"

    # ---- weight prep (once per forward): NAC transform + [W;G] stacking + bf16 cast.
    weights = []
    for p in params:
        W = jnp.tanh(p["W_"].astype(jnp.float32)) * jax.nn.sigmoid(p["M_"].astype(jnp.float32))
        WG = jnp.concatenate([W, p["G"].astype(jnp.float32)], axis=0)   # (2*out_l, in_l)
        weights.append(WG.astype(mm_dtype))

    # ---- lane-dense layout: batch on the last (lane) axis.
    xt = x.T                                                            # (in_dim, B)

    in_specs = [pl.BlockSpec((in_dim, tb), lambda i: (0, i))]
    for w in weights:
        # Constant block index: weights are DMA'd once and stay resident in VMEM.
        in_specs.append(pl.BlockSpec(w.shape, lambda i: (0, 0)))

    yt = pl.pallas_call(
        _make_fused_nalu_kernel(n_layers, out_dims),
        out_shape=jax.ShapeDtypeStruct((out_dim, B), x.dtype),
        grid_spec=pltpu.PrefetchScalarGridSpec(
            num_scalar_prefetch=0,
            grid=(B // tb,),
            in_specs=in_specs,
            out_specs=pl.BlockSpec((out_dim, tb), lambda i: (0, i)),
        ),
        compiler_params=pltpu.CompilerParams(
            dimension_semantics=("parallel",)),
    )(xt, *weights)

    return yt.T                                                         # (B, out_dim)


def xavier_uniform(key, out_shape, in_shape):
    # torch.nn.init.xavier_uniform_ on a (out, in) matrix
    bound = math.sqrt(6.0 / (in_shape + out_shape))
    return jax.random.uniform(key, (out_shape, in_shape),
                              dtype=jnp.float32, minval=-bound, maxval=bound)


def init_nalu_layer(key, input_shape, output_shape, n_layers, hidden_shape):
    params = []
    for n in range(n_layers):
        in_s = hidden_shape if n > 0 else input_shape
        out_s = hidden_shape if n < n_layers - 1 else output_shape
        key, kw, km, kg = jax.random.split(key, 4)
        params.append(dict(
            W_=xavier_uniform(kw, out_s, in_s),
            M_=xavier_uniform(km, out_s, in_s),
            G=xavier_uniform(kg, out_s, in_s),
        ))
    return params


def _nalu_layer_ref(params, x, mm_dtype=jnp.float32):
    """Pure-JAX reference mirroring the PyTorch module; matmul operands cast to
    `mm_dtype` (with f32 accumulation) to mirror the kernel's MXU precision."""
    h = x.astype(jnp.float32)
    for p in params:
        W = jnp.tanh(p["W_"]) * jax.nn.sigmoid(p["M_"])
        Wc = W.astype(mm_dtype)
        Gc = p["G"].astype(mm_dtype)
        hc = h.astype(mm_dtype)
        a = jnp.dot(hc, Wc.T, preferred_element_type=jnp.float32)
        g = jax.nn.sigmoid(jnp.dot(hc, Gc.T, preferred_element_type=jnp.float32))
        log_in = jnp.log(jnp.abs(h) + EPS)
        m = jnp.exp(jnp.dot(log_in.astype(mm_dtype), Wc.T,
                            preferred_element_type=jnp.float32))
        h = g * a + (1.0 - g) * m
    return h


if __name__ == "__main__":
    # NaluLayer(input=32, output=16, n_layers=2, hidden=32), batch=256.
    input_shape, output_shape, n_layers, hidden_shape = 32, 16, 2, 32
    batch = 256

    key = jax.random.PRNGKey(0)
    key, kx = jax.random.split(key)
    x = jax.random.normal(kx, (batch, input_shape), dtype=jnp.float32)

    params = init_nalu_layer(key, input_shape, output_shape, n_layers, hidden_shape)

    y = jax.block_until_ready(nalu_layer_forward(params, x))
    # Reference mirrors the kernel's bf16 matmul operands (f32 accumulate / elementwise).
    y_ref = _nalu_layer_ref(params, x, mm_dtype=jnp.bfloat16)

    assert y.shape == (batch, output_shape)
    assert jnp.allclose(y, y_ref, atol=2e-3, rtol=2e-3), "mismatch vs reference"
    print("KERNEL_OK")
</pallas_src>

<mosaic_0001>
module attributes {stable_mosaic.version = 11 : i64} {
  func.func @kernel(%arg0: i32, %arg1: memref<32x256xf32, #tpu.memory_space<vmem>>, %arg2: memref<64x32xbf16, #tpu.memory_space<vmem>>, %arg3: memref<32x32xbf16, #tpu.memory_space<vmem>>, %arg4: memref<16x256xf32, #tpu.memory_space<vmem>>) attributes {dimension_semantics = [#tpu.dimension_semantics<parallel>], iteration_bounds = array<i64: 1>, scalar_prefetch = 0 : i64, scratch_operands = 0 : i64, tpu.core_type = #tpu.core_type<tc>, window_params = [{transform_indices = @transform_0, window_bounds = array<i64: 32, 256>}, {pipeline_mode = #tpu.pipeline_mode<synchronous>, transform_indices = @transform_1, window_bounds = array<i64: 64, 32>}, {pipeline_mode = #tpu.pipeline_mode<synchronous>, transform_indices = @transform_2, window_bounds = array<i64: 32, 32>}, {transform_indices = @transform_3, window_bounds = array<i64: 16, 256>}]} {
    %c0 = arith.constant 0 : index
    %c0_0 = arith.constant 0 : index
    %0 = vector.load %arg1[%c0, %c0_0] : memref<32x256xf32, #tpu.memory_space<vmem>>, vector<32x256xf32>
    %c0_1 = arith.constant 0 : index
    %c0_2 = arith.constant 0 : index
    %1 = vector.load %arg2[%c0_1, %c0_2] : memref<64x32xbf16, #tpu.memory_space<vmem>>, vector<64x32xbf16>
    %2 = math.absf %0 : vector<32x256xf32>
    %cst = arith.constant 9.99999974E-6 : f32
    %3 = vector.broadcast %cst : f32 to vector<32x256xf32>
    %4 = arith.addf %2, %3 : vector<32x256xf32>
    %5 = math.log %4 : vector<32x256xf32>
    %6 = arith.truncf %0 : vector<32x256xf32> to vector<32x256xbf16>
    %cst_3 = arith.constant dense<0.000000e+00> : vector<64x256xf32>
    %7 = tpu.matmul %1, %6, %cst_3 {dimension_numbers = #tpu.dot_dimension_numbers<[1], [0], [0], [1], [0, 0, 1, 1], [], []>} : vector<64x32xbf16>, vector<32x256xbf16>, vector<64x256xf32> -> vector<64x256xf32>
    %8 = vector.extract_strided_slice %7 {offsets = [0, 0], sizes = [32, 256], strides = [1, 1]} : vector<64x256xf32> to vector<32x256xf32>
    %9 = vector.extract_strided_slice %7 {offsets = [32, 0], sizes = [32, 256], strides = [1, 1]} : vector<64x256xf32> to vector<32x256xf32>
    %10 = arith.negf %9 : vector<32x256xf32>
    %11 = math.exp %10 : vector<32x256xf32>
    %cst_4 = arith.constant 1.000000e+00 : f32
    %12 = vector.broadcast %cst_4 : f32 to vector<32x256xf32>
    %13 = arith.addf %12, %11 : vector<32x256xf32>
    %14 = arith.divf %12, %13 : vector<32x256xf32>
    %15 = vector.extract_strided_slice %1 {offsets = [0, 0], sizes = [32, 32], strides = [1, 1]} : vector<64x32xbf16> to vector<32x32xbf16>
    %16 = arith.truncf %5 : vector<32x256xf32> to vector<32x256xbf16>
    %cst_5 = arith.constant dense<0.000000e+00> : vector<32x256xf32>
    %17 = tpu.matmul %15, %16, %cst_5 {dimension_numbers = #tpu.dot_dimension_numbers<[1], [0], [0], [1], [0, 0, 1, 1], [], []>} : vector<32x32xbf16>, vector<32x256xbf16>, vector<32x256xf32> -> vector<32x256xf32>
    %18 = math.exp %17 : vector<32x256xf32>
    %19 = arith.mulf %14, %8 : vector<32x256xf32>
    %cst_6 = arith.constant 1.000000e+00 : f32
    %20 = vector.broadcast %cst_6 : f32 to vector<32x256xf32>
    %21 = arith.subf %20, %14 : vector<32x256xf32>
    %22 = arith.mulf %21, %18 : vector<32x256xf32>
    %23 = arith.addf %19, %22 : vector<32x256xf32>
    %c0_7 = arith.constant 0 : index
    %c0_8 = arith.constant 0 : index
    %24 = vector.load %arg3[%c0_7, %c0_8] : memref<32x32xbf16, #tpu.memory_space<vmem>>, vector<32x32xbf16>
    %25 = math.absf %23 : vector<32x256xf32>
    %cst_9 = arith.constant 9.99999974E-6 : f32
    %26 = vector.broadcast %cst_9 : f32 to vector<32x256xf32>
    %27 = arith.addf %25, %26 : vector<32x256xf32>
    %28 = math.log %27 : vector<32x256xf32>
    %29 = arith.truncf %23 : vector<32x256xf32> to vector<32x256xbf16>
    %cst_10 = arith.constant dense<0.000000e+00> : vector<32x256xf32>
    %30 = tpu.matmul %24, %29, %cst_10 {dimension_numbers = #tpu.dot_dimension_numbers<[1], [0], [0], [1], [0, 0, 1, 1], [], []>} : vector<32x32xbf16>, vector<32x256xbf16>, vector<32x256xf32> -> vector<32x256xf32>
    %31 = vector.extract_strided_slice %30 {offsets = [0, 0], sizes = [16, 256], strides = [1, 1]} : vector<32x256xf32> to vector<16x256xf32>
    %32 = vector.extract_strided_slice %30 {offsets = [16, 0], sizes = [16, 256], strides = [1, 1]} : vector<32x256xf32> to vector<16x256xf32>
    %33 = arith.negf %32 : vector<16x256xf32>
    %34 = math.exp %33 : vector<16x256xf32>
    %cst_11 = arith.constant 1.000000e+00 : f32
    %35 = vector.broadcast %cst_11 : f32 to vector<16x256xf32>
    %36 = arith.addf %35, %34 : vector<16x256xf32>
    %37 = arith.divf %35, %36 : vector<16x256xf32>
    %38 = vector.extract_strided_slice %24 {offsets = [0, 0], sizes = [16, 32], strides = [1, 1]} : vector<32x32xbf16> to vector<16x32xbf16>
    %39 = arith.truncf %28 : vector<32x256xf32> to vector<32x256xbf16>
    %cst_12 = arith.constant dense<0.000000e+00> : vector<16x256xf32>
    %40 = tpu.matmul %38, %39, %cst_12 {dimension_numbers = #tpu.dot_dimension_numbers<[1], [0], [0], [1], [0, 0, 1, 1], [], []>} : vector<16x32xbf16>, vector<32x256xbf16>, vector<16x256xf32> -> vector<16x256xf32>
    %41 = math.exp %40 : vector<16x256xf32>
    %42 = arith.mulf %37, %31 : vector<16x256xf32>
    %cst_13 = arith.constant 1.000000e+00 : f32
    %43 = vector.broadcast %cst_13 : f32 to vector<16x256xf32>
    %44 = arith.subf %43, %37 : vector<16x256xf32>
    %45 = arith.mulf %44, %41 : vector<16x256xf32>
    %46 = arith.addf %42, %45 : vector<16x256xf32>
    %c0_14 = arith.constant 0 : index
    %c0_15 = arith.constant 0 : index
    %47 = vector.load %arg4[%c0_14, %c0_15] : memref<16x256xf32, #tpu.memory_space<vmem>>, vector<16x256xf32>
    tpu.vector_store %arg4[%c0_14, %c0_15], %46 {strides = array<i32>} : memref<16x256xf32, #tpu.memory_space<vmem>>, vector<16x256xf32>,
    return
  }
  func.func @transform_0(%arg0: i32) -> (i32, i32) {
    %c0_i32 = arith.constant 0 : i32
    %c0_i32_0 = arith.constant 0 : i32
    return %c0_i32, %arg0 : i32, i32
  }
  func.func @transform_1(%arg0: i32) -> (i32, i32) {
    %c0_i32 = arith.constant 0 : i32
    %c0_i32_0 = arith.constant 0 : i32
    %c0_i32_1 = arith.constant 0 : i32
    return %c0_i32, %c0_i32_0 : i32, i32
  }
  func.func @transform_2(%arg0: i32) -> (i32, i32) {
    %c0_i32 = arith.constant 0 : i32
    %c0_i32_0 = arith.constant 0 : i32
    %c0_i32_1 = arith.constant 0 : i32
    return %c0_i32, %c0_i32_0 : i32, i32
  }
  func.func @transform_3(%arg0: i32) -> (i32, i32) {
    %c0_i32 = arith.constant 0 : i32
    %c0_i32_0 = arith.constant 0 : i32
    return %c0_i32, %arg0 : i32, i32
  }
}

</mosaic_0001>

<bundles_post_ra>
// kernel: tpu_custom_call.1
= control target key start
LH: loop header
LB: loop body
LE: loop exit
PB: predicated region body
PF: predicated region fallthrough
CT: control target
= control target key end

     0   :  { %8 = vsyncpa [#allocation3], 0  ;;  %s871_s0 = inlined_call_operand.hbm [shape: f32[32,256], index: 0, kind: input, shape index: {}]   ;;  %s872_s1 = inlined_call_operand.vmem [shape: bf16[64,32], index: 1, kind: input, shape index: {}]   ;;  %s873_s2 = inlined_call_operand.vmem [shape: bf16[32,32], index: 2, kind: input, shape index: {}]   ;;  %s874_s3 = inlined_call_operand.hbm [shape: f32[16,256], index: 3, kind: output, shape index: {}]  }
   0x1   :  { %9 = vsyncpa [#allocation4], 0  ;;  %s756_s12 = smov [#allocation2]   ;;  %s708_s16 = scalar_lea.hbm %s871_s0, 1024 }
   0x2   :  { %s15_s13 = sshll.u32 %s756_s12, 4  ;;  %p709_p0 = scmp.ne.s32.totalorder %s871_s0, %s708_s16  ;;  %s16_s13 = int_to_ptr.vmem [resolvable:$true] %s15_s13 }
   0x3   :  { %p712_p1 = scmp.lt.u32.totalorder %s708_s16, %s871_s0 }
   0x5   :  { %p714_p2 = pnand %p712_p1, %p709_p0 }
   0x7   :  { %717 = shalt.err (!%p714_p2)
}
   0x8   :  { %s718_s21 = scalar_lea.vmem %s16_s13, 1024  ;;  %p723_p4 = scmp.lt.s32.totalorder %s16_s13, %s16_s13 }
   0x9   :  { %p719_p3 = scmp.ne.s32.totalorder %s16_s13, %s718_s21  ;;  %p724_p5 = scmp.lt.s32.totalorder %s718_s21, %s718_s21 }
   0xb   :  { %p725_p6 = por %p724_p5, %p723_p4 }
   0xd   :  { %p726_p7 = pnand %p725_p6, %p719_p3 }
   0xf   :  { %729 = shalt.err (!%p726_p7)
}
  0x10   :  { %s757_s22 = smov 256   ;;  %s758_s23 = smov 16  }
  0x11   :  { %21 = dma.hbm_to_vmem [thread:$0]  %s871_s0, 1024, %s16_s13, [#allocation3], %s757_s22, %s757_s22, %s758_s23  }
  0x12   :  { %752 = dma.done.wait [#allocation3], 1024  }
  0x13   :  { %753 = vsyncadd [#allocation3], 4294966272  ;;  %v759_v0 = vmov 0   ;;  %v31_v1 = vld [vmem:[#allocation2 + $0x8] sm:$0xff]  ;;  %v33_v2 = vld [vmem:[#allocation2 + $0x18] sm:$0xff]  ;;  %vm102_vm0 = vcmask 261120  }
  0x14   :  { %147 = vmatprep.mubr.bf16.mxu0 %v759_v0  ;;  %272 = vmatprep.mubr.bf16.mxu1 %v759_v0  ;;  %v30_v3 = vld [vmem:[#allocation2] sm:$0xff]  ;;  %v47_v4 = vand.u32 2147483647, %v31_v1  ;;  %v49_v5 = vand.u32 2147483647, %v33_v2  ;;  %v79_v6 = vpack.c.bf16 %v33_v2, %v31_v1  ;;  %v32_v7 = vld [vmem:[#allocation2 + $0x10] sm:$0xff] }
  0x15   :  { %v35_v8 = vld [vmem:[#allocation2 + $0x28] sm:$0xff]  ;;  %v46_v9 = vand.u32 2147483647, %v30_v3  ;;  %v48_v10 = vand.u32 2147483647, %v32_v7  ;;  %v78_v11 = vpack.c.bf16 %v32_v7, %v30_v3  ;;  %v37_v12 = vld [vmem:[#allocation2 + $0x38] sm:$0xff] }
  0x16   :  { %v34_v13 = vld [vmem:[#allocation2 + $0x20] sm:$0xff]  ;;  %v55_v14 = vadd.f32 1e-05, %v47_v4  ;;  %v57_v15 = vadd.f32 1e-05, %v49_v5  ;;  %115 = vmatprep.subr.bf16.mxu0 %v79_v6  ;;  %v81_v17 = vpack.c.bf16 %v37_v12, %v35_v8  ;;  %v36_v22 = vld [vmem:[#allocation2 + $0x30] sm:$0xff] }
  0x17   :  { %v51_v16 = vand.u32 2147483647, %v35_v8  ;;  %v54_v18 = vadd.f32 1e-05, %v46_v9  ;;  %v56_v19 = vadd.f32 1e-05, %v48_v10  ;;  %116 = vmatpush1.bf16.msra.mxu0 %v78_v11  ;;  %v80_v27 = vpack.c.bf16 %v36_v22, %v34_v13 }
  0x18   :  { %v53_v20 = vand.u32 2147483647, %v37_v12  ;;  %604 = vlog2.f32 %v55_v14  ;;  %117 = vmatprep.subr.bf16.mxu0 %v81_v17  ;;  %v50_v23 = vand.u32 2147483647, %v34_v13  ;;  %v598_v24 = vld [vmem:[%s872_s1] sm:$0xff]   ;;  %v599_v31 = vld [vmem:[%s872_s1 + $0x8] sm:$0xff]  }
  0x19   :  { %v59_v21 = vadd.f32 1e-05, %v51_v16  ;;  %606 = vlog2.f32 %v57_v15  ;;  %v52_v26 = vand.u32 2147483647, %v36_v22  ;;  %v600_v48 = vld [vmem:[%s872_s1 + $0x10] sm:$0xff]   ;;  %v601_v52 = vld [vmem:[%s872_s1 + $0x18] sm:$0xff]  }
  0x1a   :  { %v61_v25 = vadd.f32 1e-05, %v53_v20  ;;  %608 = vlog2.f32 %v54_v18  ;;  %v58_v28 = vadd.f32 1e-05, %v50_v23 }
  0x1b   :  { %610 = vlog2.f32 %v56_v19  ;;  %v60_v29 = vadd.f32 1e-05, %v52_v26  ;;  %118 = vmatpush1.bf16.msra.mxu0 %v80_v27 }
  0x1c   :  { %612 = vlog2.f32 %v59_v21 }
  0x1d   :  { %614 = vlog2.f32 %v61_v25 }
  0x1e   :  { %616 = vlog2.f32 %v58_v28  ;;  %570 = vmatmul.mubr.msk.bf16.vlgmr.msra.gmra.mrb[0].mxu0 %vm102_vm0, %v598_v24 }
  0x1f   :  { %618 = vlog2.f32 %v60_v29  ;;  %157 = vmatprep.mubr.bf16.mxu0 %v759_v0 }
  0x22   :  { %v605_v30 = vpop.eup %604 }
  0x23   :  { %v607_v32 = vpop.eup %606  ;;  %v65_v33 = vmul.f32 0.6931472, %v605_v30 }
  0x24   :  { %v609_v34 = vpop.eup %608  ;;  %v69_v35 = vmul.f32 0.6931472, %v607_v32 }
  0x25   :  { %v611_v36 = vpop.eup %610  ;;  %v63_v37 = vmul.f32 0.6931472, %v609_v34 }
  0x26   :  { %v613_v38 = vpop.eup %612  ;;  %571 = vmatmul.mubr.msk.bf16.gmra.mrb[4].mxu0 %vm102_vm0, %v599_v31  ;;  %v237_v39 = vpack.c.bf16 %v69_v35, %v65_v33  ;;  %v67_v40 = vmul.f32 0.6931472, %v611_v36 }
  0x27   :  { %v615_v41 = vpop.eup %614  ;;  %167 = vmatprep.mubr.bf16.mxu0 %v759_v0  ;;  %v73_v42 = vmul.f32 0.6931472, %v613_v38 }
  0x28   :  { %v617_v43 = vpop.eup %616  ;;  %240 = vmatprep.subr.bf16.mxu1 %v237_v39  ;;  %v236_v44 = vpack.c.bf16 %v67_v40, %v63_v37  ;;  %v77_v45 = vmul.f32 0.6931472, %v615_v41 }
  0x29   :  { %v619_v46 = vpop.eup %618  ;;  %v71_v47 = vmul.f32 0.6931472, %v617_v43 }
  0x2a   :  { %241 = vmatpush1.bf16.msra.mxu1 %v236_v44  ;;  %v239_v49 = vpack.c.bf16 %v77_v45, %v73_v42  ;;  %v75_v50 = vmul.f32 0.6931472, %v619_v46 }
  0x2c   :  { %242 = vmatprep.subr.bf16.mxu1 %v239_v49  ;;  %v238_v51 = vpack.c.bf16 %v75_v50, %v71_v47 }
  0x2e   :  { %572 = vmatmul.mubr.msk.bf16.gmra.mrb[8].mxu0 %vm102_vm0, %v600_v48  ;;  %243 = vmatpush1.bf16.msra.mxu1 %v238_v51 }
  0x2f   :  { %177 = vmatprep.mubr.bf16.mxu0 %v759_v0 }
  0x31   :  { %582 = vmatmul.mubr.msk.bf16.vlgmr.msra.gmra.mrb[0].mxu1 %vm102_vm0, %v598_v24 }
  0x32   :  { %282 = vmatprep.mubr.bf16.mxu1 %v759_v0 }
  0x36   :  { %573 = vmatmul.mubr.msk.bf16.gmra.mrb[12].mxu0 %vm102_vm0, %v601_v52 }
  0x37   :  { %510 = vmatprep.mubr.bf16.mxu0 %v759_v0 }
  0x39   :  { %583 = vmatmul.mubr.msk.bf16.gmra.mrb[4].mxu1 %vm102_vm0, %v599_v31 }
  0x3a   :  { %429 = vmatprep.mubr.bf16.mxu1 %v759_v0 }
  0xf1   :  { %v822_v53 = vpop.f32.mrb[0].mxu0 }
  0xf2   :  { %v824_v54 = vpop.f32.mrb[1].mxu0 }
  0xf3   :  { %v826_v55 = vpop.f32.mrb[2].mxu0 }
  0xf4   :  { %v828_v56 = vpop.f32.mrb[3].mxu0 }
  0xf9   :  { %v830_v57 = vpop.f32.mrb[4].mxu0 }
  0xfa   :  { %v832_v58 = vpop.f32.mrb[5].mxu0 }
  0xfb   :  { %v834_v59 = vpop.f32.mrb[6].mxu0 }
  0xfc   :  { %v836_v60 = vpop.f32.mrb[7].mxu0 }
 0x101   :  { %v169_v61 = vpop.f32.mrb[8].mxu0 }
 0x102   :  { %v574_v62 = vmul.f32 -1.442695, %v169_v61  ;;  %v171_v63 = vpop.f32.mrb[9].mxu0 }
 0x103   :  { %v575_v1 = vmul.f32 -1.442695, %v171_v63  ;;  %v173_v2 = vpop.f32.mrb[10].mxu0 }
 0x104   :  { %620 = vpow2.f32 %v574_v62  ;;  %v576_v3 = vmul.f32 -1.442695, %v173_v2  ;;  %v175_v4 = vpop.f32.mrb[11].mxu0  ;;  %v274_v5 = vpop.f32.mrb[0].mxu1 }
 0x105   :  { %622 = vpow2.f32 %v575_v1  ;;  %v577_v6 = vmul.f32 -1.442695, %v175_v4  ;;  %v276_v7 = vpop.f32.mrb[1].mxu1  ;;  %v293_v9 = vmul.f32 1.442695, %v274_v5 }
 0x106   :  { %624 = vpow2.f32 %v576_v3  ;;  %v278_v8 = vpop.f32.mrb[2].mxu1  ;;  %v295_v18 = vmul.f32 1.442695, %v276_v7 }
 0x107   :  { %626 = vpow2.f32 %v577_v6  ;;  %v280_v10 = vpop.f32.mrb[3].mxu1  ;;  %v297_v31 = vmul.f32 1.442695, %v278_v8 }
 0x108   :  { %628 = vpow2.f32 %v293_v9  ;;  %v299_v33 = vmul.f32 1.442695, %v280_v10 }
 0x109   :  { %v179_v11 = vpop.f32.mrb[12].mxu0 }
 0x10a   :  { %v578_v12 = vmul.f32 -1.442695, %v179_v11  ;;  %v181_v13 = vpop.f32.mrb[13].mxu0 }
 0x10b   :  { %v579_v14 = vmul.f32 -1.442695, %v181_v13  ;;  %v183_v15 = vpop.f32.mrb[14].mxu0 }
 0x10c   :  { %630 = vpow2.f32 %v578_v12  ;;  %v580_v16 = vmul.f32 -1.442695, %v183_v15  ;;  %v185_v17 = vpop.f32.mrb[15].mxu0  ;;  %v284_v19 = vpop.f32.mrb[4].mxu1 }
 0x10d   :  { %632 = vpow2.f32 %v579_v14  ;;  %v581_v20 = vmul.f32 -1.442695, %v185_v17  ;;  %v286_v21 = vpop.f32.mrb[5].mxu1  ;;  %v301_v34 = vmul.f32 1.442695, %v284_v19 }
 0x10e   :  { %v621_v22 = vpop.eup %620  ;;  %634 = vpow2.f32 %v580_v16  ;;  %v288_v23 = vpop.f32.mrb[6].mxu1  ;;  %v303_v35 = vmul.f32 1.442695, %v286_v21 }
 0x10f   :  { %v623_v24 = vpop.eup %622  ;;  %v212_v25 = vadd.f32 1.0, %v621_v22  ;;  %636 = vpow2.f32 %v581_v20  ;;  %v290_v26 = vpop.f32.mrb[7].mxu1  ;;  %v305_v44 = vmul.f32 1.442695, %v288_v23 }
 0x110   :  { %v625_v27 = vpop.eup %624  ;;  %v213_v28 = vadd.f32 1.0, %v623_v24  ;;  %638 = vpow2.f32 %v295_v18  ;;  %v307_v47 = vmul.f32 1.442695, %v290_v26 }
 0x111   :  { %v627_v29 = vpop.eup %626  ;;  %640 = vrcp.f32 %v212_v25  ;;  %v214_v30 = vadd.f32 1.0, %v625_v27 }
 0x112   :  { %642 = vrcp.f32 %v213_v28  ;;  %v215_v32 = vadd.f32 1.0, %v627_v29  ;;  %v629_v36 = vpop.eup %628 }
 0x113   :  { %644 = vrcp.f32 %v214_v30 }
 0x114   :  { %646 = vrcp.f32 %v215_v32 }
 0x115   :  { %648 = vpow2.f32 %v297_v31 }
 0x116   :  { %v631_v37 = vpop.eup %630  ;;  %650 = vpow2.f32 %v299_v33 }
 0x117   :  { %v633_v38 = vpop.eup %632  ;;  %v216_v39 = vadd.f32 1.0, %v631_v37  ;;  %652 = vpow2.f32 %v301_v34 }
 0x118   :  { %v635_v40 = vpop.eup %634  ;;  %v217_v41 = vadd.f32 1.0, %v633_v38  ;;  %654 = vpow2.f32 %v303_v35 }
 0x119   :  { %v637_v42 = vpop.eup %636  ;;  %656 = vrcp.f32 %v216_v39  ;;  %v218_v43 = vadd.f32 1.0, %v635_v40 }
 0x11a   :  { %v639_v45 = vpop.eup %638  ;;  %658 = vrcp.f32 %v217_v41  ;;  %v219_v46 = vadd.f32 1.0, %v637_v42 }
 0x11b   :  { %v641_v48 = vpop.eup %640  ;;  %660 = vrcp.f32 %v218_v43 }
 0x11c   :  { %v643_v49 = vpop.eup %642  ;;  %662 = vrcp.f32 %v219_v46  ;;  %v309_v50 = vmul.f32 %v641_v48, %v822_v53  ;;  %v317_v51 = vsub.f32 1.0, %v641_v48 }
 0x11d   :  { %v645_v52 = vpop.eup %644  ;;  %664 = vpow2.f32 %v305_v44  ;;  %v310_v61 = vmul.f32 %v643_v49, %v824_v54  ;;  %v318_v62 = vsub.f32 1.0, %v643_v49 }
 0x11e   :  { %v647_v63 = vpop.eup %646  ;;  %666 = vpow2.f32 %v307_v47  ;;  %v311_v1 = vmul.f32 %v645_v52, %v826_v55  ;;  %v319_v2 = vsub.f32 1.0, %v645_v52  ;;  %v325_v3 = vmul.f32 %v629_v36, %v317_v51  ;;  %v602_v51 = vld [vmem:[%s873_s2] sm:$0xff]  }
 0x11f   :  { %v649_v4 = vpop.eup %648  ;;  %v312_v5 = vmul.f32 %v647_v63, %v828_v56  ;;  %v320_v6 = vsub.f32 1.0, %v647_v63  ;;  %v326_v7 = vmul.f32 %v639_v45, %v318_v62 }
 0x120   :  { %v651_v8 = vpop.eup %650  ;;  %v327_v9 = vmul.f32 %v649_v4, %v319_v2  ;;  %v333_v53 = vadd.f32 %v325_v3, %v309_v50 }
 0x121   :  { %v653_v10 = vpop.eup %652  ;;  %v328_v11 = vmul.f32 %v651_v8, %v320_v6  ;;  %v334_v12 = vadd.f32 %v326_v7, %v310_v61  ;;  %v603_v6 = vld [vmem:[%s873_s2 + $0x8] sm:$0xff]   ;;  %s760_s2 = smov [#allocation5]  }
 0x122   :  { %v655_v13 = vpop.eup %654  ;;  %v335_v54 = vadd.f32 %v327_v9, %v311_v1  ;;  %v345_v14 = vand.u32 2147483647, %v333_v53  ;;  %s554_s9 = sshll.u32 %s760_s2, 4  ;;  %s555_s9 = int_to_ptr.vmem [resolvable:$true] %s554_s9 }
 0x123   :  { %v657_v15 = vpop.eup %656  ;;  %v336_v16 = vadd.f32 %v328_v11, %v312_v5  ;;  %v346_v17 = vand.u32 2147483647, %v334_v12  ;;  %s730_s10 = scalar_lea.vmem %s555_s9, 512  ;;  %p735_p9 = scmp.lt.s32.totalorder %s555_s9, %s555_s9 }
 0x124   :  { %v659_v55 = vpop.eup %658  ;;  %v347_v18 = vand.u32 2147483647, %v335_v54  ;;  %v353_v19 = vadd.f32 1e-05, %v345_v14  ;;  %v377_v20 = vpack.c.bf16 %v335_v54, %v333_v53  ;;  %v313_v56 = vmul.f32 %v657_v15, %v830_v57  ;;  %p731_p8 = scmp.ne.s32.totalorder %s555_s9, %s730_s10  ;;  %p736_p10 = scmp.lt.s32.totalorder %s730_s10, %s730_s10 }
 0x125   :  { %v661_v21 = vpop.eup %660  ;;  %v348_v22 = vand.u32 2147483647, %v336_v16  ;;  %v354_v23 = vadd.f32 1e-05, %v346_v17  ;;  %v378_v24 = vpack.c.bf16 %v336_v16, %v334_v12  ;;  %v314_v25 = vmul.f32 %v659_v55, %v832_v58 }
 0x126   :  { %v663_v26 = vpop.eup %662  ;;  %v355_v27 = vadd.f32 1e-05, %v347_v18  ;;  %v322_v28 = vsub.f32 1.0, %v659_v55  ;;  %v315_v29 = vmul.f32 %v661_v21, %v834_v59  ;;  %v321_v30 = vsub.f32 1.0, %v657_v15  ;;  %p737_p11 = por %p736_p10, %p735_p9 }
 0x127   :  { %v665_v31 = vpop.eup %664  ;;  %v356_v32 = vadd.f32 1e-05, %v348_v22  ;;  %397 = vmatprep.subr.bf16.mxu1 %v378_v24  ;;  %v316_v33 = vmul.f32 %v663_v26, %v836_v60  ;;  %v324_v34 = vsub.f32 1.0, %v663_v26  ;;  %v323_v35 = vsub.f32 1.0, %v661_v21 }
 0x128   :  { %v667_v57 = vpop.eup %666  ;;  %398 = vmatpush1.bf16.msra.mxu1 %v377_v20  ;;  %v330_v36 = vmul.f32 %v655_v13, %v322_v28  ;;  %v329_v37 = vmul.f32 %v653_v10, %v321_v30  ;;  %668 = vlog2.f32 %v354_v23  ;;  %p738_p12 = pnand %p737_p11, %p731_p8 }
 0x129   :  { %v332_v38 = vmul.f32 %v667_v57, %v324_v34  ;;  %v331_v58 = vmul.f32 %v665_v31, %v323_v35  ;;  %670 = vlog2.f32 %v356_v32 }
 0x12a   :  { %v338_v39 = vadd.f32 %v330_v36, %v314_v25  ;;  %v337_v40 = vadd.f32 %v329_v37, %v313_v56  ;;  %672 = vlog2.f32 %v353_v19 }
 0x12b   :  { %v340_v59 = vadd.f32 %v332_v38, %v316_v33  ;;  %v339_v41 = vadd.f32 %v331_v58, %v315_v29  ;;  %674 = vlog2.f32 %v355_v27 }
 0x12c   :  { %v350_v42 = vand.u32 2147483647, %v338_v39  ;;  %v349_v43 = vand.u32 2147483647, %v337_v40 }
 0x12d   :  { %v352_v44 = vand.u32 2147483647, %v340_v59  ;;  %v380_v60 = vpack.c.bf16 %v340_v59, %v338_v39  ;;  %v351_v45 = vand.u32 2147483647, %v339_v41  ;;  %v379_v46 = vpack.c.bf16 %v339_v41, %v337_v40 }
 0x12e   :  { %v358_v47 = vadd.f32 1e-05, %v350_v42  ;;  %v357_v48 = vadd.f32 1e-05, %v349_v43 }
 0x12f   :  { %v360_v49 = vadd.f32 1e-05, %v352_v44  ;;  %399 = vmatprep.subr.bf16.mxu1 %v380_v60  ;;  %v359_v50 = vadd.f32 1e-05, %v351_v45 }
 0x130   :  { %400 = vmatpush1.bf16.msra.mxu1 %v379_v46  ;;  %676 = vlog2.f32 %v358_v47 }
 0x131   :  { %678 = vlog2.f32 %v360_v49 }
 0x132   :  { %v669_v52 = vpop.eup %668  ;;  %680 = vlog2.f32 %v357_v48 }
 0x133   :  { %v671_v61 = vpop.eup %670  ;;  %586 = vmatmul.mubr.msk.bf16.vlgmr.msra.gmra.mrb[8].mxu1 %vm102_vm0, %v602_v51  ;;  %682 = vlog2.f32 %v359_v50  ;;  %v364_v63 = vmul.f32 0.6931472, %v669_v52 }
 0x134   :  { %v673_v62 = vpop.eup %672  ;;  %v368_v1 = vmul.f32 0.6931472, %v671_v61  ;;  %439 = vmatprep.mubr.bf16.mxu1 %v759_v0 }
 0x135   :  { %v675_v2 = vpop.eup %674  ;;  %v362_v4 = vmul.f32 0.6931472, %v673_v62 }
 0x136   :  { %v475_v3 = vpack.c.bf16 %v368_v1, %v364_v63  ;;  %v366_v5 = vmul.f32 0.6931472, %v675_v2 }
 0x138   :  { %478 = vmatprep.subr.bf16.mxu0 %v475_v3  ;;  %v474_v7 = vpack.c.bf16 %v366_v5, %v362_v4 }
 0x13a   :  { %v677_v8 = vpop.eup %676  ;;  %479 = vmatpush1.bf16.msra.mxu0 %v474_v7 }
 0x13b   :  { %v679_v9 = vpop.eup %678  ;;  %587 = vmatmul.mubr.msk.bf16.gmra.mrb[12].mxu1 %vm102_vm0, %v603_v6  ;;  %v372_v10 = vmul.f32 0.6931472, %v677_v8 }
 0x13c   :  { %v681_v53 = vpop.eup %680  ;;  %v376_v11 = vmul.f32 0.6931472, %v679_v9 }
 0x13d   :  { %v683_v12 = vpop.eup %682  ;;  %v370_v13 = vmul.f32 0.6931472, %v681_v53 }
 0x13e   :  { %v477_v0 = vpack.c.bf16 %v376_v11, %v372_v10  ;;  %v374_v54 = vmul.f32 0.6931472, %v683_v12 }
 0x140   :  { %480 = vmatprep.subr.bf16.mxu0 %v477_v0  ;;  %v476_v14 = vpack.c.bf16 %v374_v54, %v370_v13 }
 0x142   :  { %481 = vmatpush1.bf16.msra.mxu0 %v476_v14 }
 0x145   :  { %592 = vmatmul.mubr.msk.bf16.vlgmr.msra.gmra.mrb[16].mxu0 %vm102_vm0, %v602_v51 }
 0x206   :  { %v431_v15 = vpop.f32.mrb[8].mxu1 }
 0x207   :  { %v433_v16 = vpop.f32.mrb[9].mxu1 }
 0x208   :  { %v435_v17 = vpop.f32.mrb[10].mxu1 }
 0x209   :  { %v437_v55 = vpop.f32.mrb[11].mxu1 }
 0x20e   :  { %v441_v18 = vpop.f32.mrb[12].mxu1 }
 0x20f   :  { %v588_v19 = vmul.f32 -1.442695, %v441_v18  ;;  %v443_v20 = vpop.f32.mrb[13].mxu1 }
 0x210   :  { %v589_v56 = vmul.f32 -1.442695, %v443_v20  ;;  %v445_v21 = vpop.f32.mrb[14].mxu1 }
 0x211   :  { %684 = vpow2.f32 %v588_v19  ;;  %v590_v22 = vmul.f32 -1.442695, %v445_v21  ;;  %v447_v23 = vpop.f32.mrb[15].mxu1 }
 0x212   :  { %686 = vpow2.f32 %v589_v56  ;;  %v591_v24 = vmul.f32 -1.442695, %v447_v23 }
 0x213   :  { %688 = vpow2.f32 %v590_v22 }
 0x214   :  { %690 = vpow2.f32 %v591_v24 }
 0x218   :  { %v512_v25 = vpop.f32.mrb[16].mxu0 }
 0x219   :  { %v521_v26 = vmul.f32 1.442695, %v512_v25  ;;  %v514_v27 = vpop.f32.mrb[17].mxu0 }
 0x21a   :  { %v523_v28 = vmul.f32 1.442695, %v514_v27  ;;  %v516_v29 = vpop.f32.mrb[18].mxu0 }
 0x21b   :  { %v685_v30 = vpop.eup %684  ;;  %v518_v31 = vpop.f32.mrb[19].mxu0  ;;  %692 = vpow2.f32 %v521_v26  ;;  %v525_v37 = vmul.f32 1.442695, %v516_v29 }
 0x21c   :  { %v687_v32 = vpop.eup %686  ;;  %v462_v33 = vadd.f32 1.0, %v685_v30  ;;  %694 = vpow2.f32 %v523_v28  ;;  %v527_v58 = vmul.f32 1.442695, %v518_v31 }
 0x21d   :  { %v689_v34 = vpop.eup %688  ;;  %v463_v35 = vadd.f32 1.0, %v687_v32 }
 0x21e   :  { %v691_v57 = vpop.eup %690  ;;  %696 = vrcp.f32 %v462_v33  ;;  %v464_v36 = vadd.f32 1.0, %v689_v34 }
 0x21f   :  { %698 = vrcp.f32 %v463_v35  ;;  %v465_v38 = vadd.f32 1.0, %v691_v57 }
 0x220   :  { %700 = vrcp.f32 %v464_v36 }
 0x221   :  { %702 = vrcp.f32 %v465_v38 }
 0x222   :  { %704 = vpow2.f32 %v525_v37 }
 0x223   :  { %706 = vpow2.f32 %v527_v58 }
 0x225   :  { %v693_v39 = vpop.eup %692 }
 0x226   :  { %v695_v40 = vpop.eup %694 }
 0x228   :  { %v697_v59 = vpop.eup %696 }
 0x229   :  { %v699_v41 = vpop.eup %698  ;;  %v533_v42 = vsub.f32 1.0, %v697_v59  ;;  %v529_v43 = vmul.f32 %v697_v59, %v431_v15 }
 0x22a   :  { %v701_v44 = vpop.eup %700  ;;  %v534_v60 = vsub.f32 1.0, %v699_v41  ;;  %v530_v45 = vmul.f32 %v699_v41, %v433_v16 }
 0x22b   :  { %v703_v46 = vpop.eup %702  ;;  %v537_v47 = vmul.f32 %v693_v39, %v533_v42  ;;  %v535_v48 = vsub.f32 1.0, %v701_v44  ;;  %v531_v49 = vmul.f32 %v701_v44, %v435_v17 }
 0x22c   :  { %v705_v50 = vpop.eup %704  ;;  %v538_v51 = vmul.f32 %v695_v40, %v534_v60  ;;  %v536_v52 = vsub.f32 1.0, %v703_v46  ;;  %v532_v61 = vmul.f32 %v703_v46, %v437_v55 }
 0x22d   :  { %v707_v62 = vpop.eup %706  ;;  %v539_v63 = vmul.f32 %v705_v50, %v535_v48  ;;  %v541_v1 = vadd.f32 %v537_v47, %v529_v43 }
 0x22e   :  { %v540_v2 = vmul.f32 %v707_v62, %v536_v52  ;;  %v542_v3 = vadd.f32 %v538_v51, %v530_v45 }
 0x22f   :  { %v543_v4 = vadd.f32 %v539_v63, %v531_v49  ;;  %545 = vst [vmem:[#allocation5] sm:$0xff] %v541_v1 }
 0x230   :  { %v544_v5 = vadd.f32 %v540_v2, %v532_v61  ;;  %546 = vst [vmem:[#allocation5 + $0x8] sm:$0xff] %v542_v3 }
 0x231   :  { %547 = vst [vmem:[#allocation5 + $0x10] sm:$0xff] %v543_v4 }
 0x232   :  { %548 = vst [vmem:[#allocation5 + $0x18] sm:$0xff] %v544_v5 }
 0x233   :  { %741 = shalt.err (!%p738_p12)
}
 0x234   :  { %s742_s13 = scalar_lea.hbm %s874_s3, 512 }
 0x235   :  { %p743_p13 = scmp.ne.s32.totalorder %s874_s3, %s742_s13  ;;  %p746_p0 = scmp.lt.u32.totalorder %s742_s13, %s874_s3 }
 0x237   :  { %p748_p1 = pnand %p746_p0, %p743_p13 }
 0x239   :  { %751 = shalt.err (!%p748_p1)
}
 0x23a   :  { %560 = dma.vmem_to_hbm [thread:$0]  %s555_s9, 512, %s874_s3, [#allocation4], %s757_s22, %s757_s22, %s758_s23  }
 0x23b   :  { %754 = dma.done.wait [#allocation4], 512  }
 0x23c   :  { %755 = vsyncadd [#allocation4], 4294966784 }
 0x23d   :  { %564 = vsyncpa [#allocation3], 1 }
 0x23e   :  { %565 = vsyncpa [#allocation4], 1 }

</bundles_post_ra>
